<compile_context>
chip_gen: v7x
topology: tpu7x:2x2x1
jax: 0.10.0
libtpu: 0.0.40
codegen_flags: <defaults>
</compile_context>

<pallas_src>
import functools
import inspect

import jax
import jax.numpy as jnp
from jax.experimental import pallas as pl
from jax.experimental.pallas import tpu as pltpu

_LANE = 128  # TPU lane width (last-dim vector width)


def _round_up(x, m):
    return ((x + m - 1) // m) * m


# --------------------------------------------------------------------------
# Hardware / capability queries (cached, trace-time only -- never a runtime
# execute-and-catch probe).
# --------------------------------------------------------------------------
@functools.lru_cache(maxsize=1)
def _physical_vmem_bytes():
    try:
        v = int(getattr(pltpu.get_tpu_info(), "vmem_capacity_bytes", 0))
        if v > 0:
            return v
    except Exception:
        pass
    try:
        kind = jax.devices()[0].device_kind.lower()
        if "v7" in kind:
            return 64 << 20          # v7x: 64 MiB per TensorCore
    except Exception:
        pass
    return 128 << 20                 # v5e / v6e


@functools.lru_cache(maxsize=1)
def _single_buffer_supported():
    """Can BlockSpec take pipeline_mode=pl.Buffered(1)?  Checked by lowering a
    tiny probe kernel only -- no execution, so a failure here can only mean the
    feature is unsupported, never a runtime problem like VMEM OOM."""
    if not hasattr(pl, "Buffered"):
        return False
    try:
        if "pipeline_mode" not in inspect.signature(pl.BlockSpec).parameters:
            return False
    except (TypeError, ValueError):
        pass

    def probe_kernel(x_ref, w_ref, o_ref):
        o_ref[...] = x_ref[...] + w_ref[...]

    try:
        probe = pl.pallas_call(
            probe_kernel,
            out_shape=jax.ShapeDtypeStruct((8, _LANE), jnp.float32),
            grid_spec=pltpu.PrefetchScalarGridSpec(
                num_scalar_prefetch=0,
                grid=(1,),
                in_specs=[
                    pl.BlockSpec((8, _LANE), lambda i: (0, 0)),
                    pl.BlockSpec((8, _LANE), lambda i: (0, 0),
                                 pipeline_mode=pl.Buffered(1)),
                ],
                out_specs=pl.BlockSpec((8, _LANE), lambda i: (0, 0)),
            ),
        )
        sds = jax.ShapeDtypeStruct((8, _LANE), jnp.float32)
        jax.jit(probe).lower(sds, sds)     # lowering only, no execution
        return True
    except Exception:
        return False


# --------------------------------------------------------------------------
# Tiling / VMEM-budget policy
# --------------------------------------------------------------------------
def _choose_tm(M, C, H, act_itemsize, quantum, target=512):
    """Row-tile choice: as large as practical (default 512 on all generations),
    but (a) >=2 grid steps when M allows it so v7x's two TensorCores both get
    work, and (b) clamped so the per-step working set stays well inside VMEM
    for larger C."""
    # per tile row: 2x double-buffered input + 2x double-buffered output
    # (act_itemsize each) + f32 intermediates h (H) and o (C).
    per_row = 4 * C * act_itemsize + 4 * (H + C)
    vmem_cap_rows = max(quantum, ((24 << 20) // max(per_row, 1)) // quantum * quantum)
    target = min(target, vmem_cap_rows)

    if M <= quantum:
        return M                                   # single whole-array block
    if M <= 2 * target:
        return max(quantum, (M // 2) // quantum * quantum)   # >= 2 grid steps
    return target


def _vmem_limit_bytes(tm, C, H, act_itemsize, w_itemsize, single_buffer):
    weights = (C * H + H + H * C + C) * w_itemsize
    weights *= 1 if single_buffer else 2
    io = 2 * tm * C * act_itemsize * 2            # double-buffered x in + out
    scratch = tm * H * 4 + tm * C * 4             # f32 intermediates
    need = int((weights + io + scratch) * 1.5) + (4 << 20)

    phys = _physical_vmem_bytes()
    # v7x (64 MiB): leave headroom for compiler-internal scratch; v5e/v6e
    # (128 MiB): allow up to ~100 MiB so larger C keeps the resident path.
    cap = min(phys - (12 << 20), 100 << 20)
    return int(min(max(need, 32 << 20), cap))


# --------------------------------------------------------------------------
# Kernel
# --------------------------------------------------------------------------
def _ffn_kernel(x_ref, w1_ref, b1_ref, w2_ref, b2_ref, o_ref):
    # x_ref: (tm, C), w1_ref: (C, H), b1_ref: (1, H),
    # w2_ref: (H, C), b2_ref: (1, C), o_ref: (tm, C)
    h = jnp.dot(x_ref[...], w1_ref[...], preferred_element_type=jnp.float32)
    h = jnp.maximum(h + b1_ref[...].astype(jnp.float32), 0.0)   # bias + ReLU (f32)
    o = jnp.dot(h.astype(w2_ref.dtype), w2_ref[...],
                preferred_element_type=jnp.float32)
    o = o + b2_ref[...].astype(jnp.float32)
    o_ref[...] = o.astype(o_ref.dtype)


@functools.partial(
    jax.jit,
    static_argnames=("tm", "single_buffer_weights", "vmem_limit_bytes"))
def _ffn_pallas(x2, w1, b1, w2, b2, *, tm, single_buffer_weights,
                vmem_limit_bytes):
    M, C = x2.shape
    H = w1.shape[1]
    grid_m = pl.cdiv(M, tm)        # ragged last block is masked by Pallas

    b1_2 = b1.reshape(1, H)
    b2_2 = b2.reshape(1, C)

    # Accurate advisory estimate: logical flops, per-operand itemsizes, exact
    # (unamplified) output bytes.
    cost = pl.CostEstimate(
        flops=2 * M * C * H + 2 * M * H * C,
        transcendentals=0,
        bytes_accessed=(M * C * x2.dtype.itemsize            # x read
                        + M * C * x2.dtype.itemsize          # out write
                        + C * H * w1.dtype.itemsize
                        + H * b1.dtype.itemsize
                        + H * C * w2.dtype.itemsize
                        + C * b2.dtype.itemsize),
    )

    # Weights/biases never change across the grid -> single VMEM buffer when
    # the installed JAX supports it (checked once at lowering time).
    resident = {"pipeline_mode": pl.Buffered(1)} if single_buffer_weights else {}

    in_specs = [
        pl.BlockSpec((tm, C), lambda i: (i, 0)),                # x row tile
        pl.BlockSpec((C, H), lambda i: (0, 0), **resident),     # W1 (resident)
        pl.BlockSpec((1, H), lambda i: (0, 0), **resident),     # b1
        pl.BlockSpec((H, C), lambda i: (0, 0), **resident),     # W2 (resident)
        pl.BlockSpec((1, C), lambda i: (0, 0), **resident),     # b2
    ]

    return pl.pallas_call(
        _ffn_kernel,
        out_shape=jax.ShapeDtypeStruct((M, C), x2.dtype),
        grid_spec=pltpu.PrefetchScalarGridSpec(
            num_scalar_prefetch=0,
            grid=(grid_m,),
            in_specs=in_specs,
            out_specs=pl.BlockSpec((tm, C), lambda i: (i, 0)),
        ),
        compiler_params=pltpu.CompilerParams(
            dimension_semantics=("parallel",),
            vmem_limit_bytes=vmem_limit_bytes),
        cost_estimate=cost,
    )(x2, w1, b1_2, w2, b2_2)


# --------------------------------------------------------------------------
# Public wrapper
# --------------------------------------------------------------------------
def feed_forward(x, w1, b1, w2, b2, *, tm=None):
    """x: [B, T, C] -> [B, T, C]  (Linear -> ReLU -> Linear, dropout=identity)."""
    # TODO(synk): training-mode dropout (stochastic masking with pltpu.prng_*)
    #             is not implemented; this is the eval-mode forward pass.
    B, T, C = x.shape
    H = w1.shape[1]
    M = B * T
    x2 = x.reshape(M, C)

    quantum = 16 if x.dtype == jnp.bfloat16 else 8    # sublane packing quantum
    if tm is None:
        tm = _choose_tm(M, C, H, x.dtype.itemsize, quantum)
    else:
        tm = min(int(tm), M)
        if tm < M:
            tm = max(quantum, (tm // quantum) * quantum)

    single = _single_buffer_supported()
    vlim = _vmem_limit_bytes(tm, C, H, x.dtype.itemsize, w1.dtype.itemsize,
                             single)

    out2 = _ffn_pallas(x2, w1, b1, w2, b2,
                       tm=int(tm),
                       single_buffer_weights=bool(single),
                       vmem_limit_bytes=int(vlim))
    return out2.reshape(B, T, C)


def init_params(key, n_embed, dtype=jnp.float32):
    """Deterministic init matching nn.Linear shapes: U(-1/sqrt(fan_in), +)."""
    h = 4 * n_embed
    k1, k2, k3, k4 = jax.random.split(key, 4)
    s1 = 1.0 / jnp.sqrt(n_embed)
    s2 = 1.0 / jnp.sqrt(h)
    # Stored as (in, out) so the kernel does x @ W (PyTorch stores (out, in)).
    w1 = jax.random.uniform(k1, (n_embed, h), dtype, -s1, s1)
    b1 = jax.random.uniform(k2, (h,), dtype, -s1, s1)
    w2 = jax.random.uniform(k3, (h, n_embed), dtype, -s2, s2)
    b2 = jax.random.uniform(k4, (n_embed,), dtype, -s2, s2)
    return w1, b1, w2, b2


if __name__ == "__main__":
    N_EMBED = 32          # config.N_EMBED
    B, T = 2, 8           # batch, sequence length
    key = jax.random.PRNGKey(0)
    kx, kp = jax.random.split(key)

    x = jax.random.normal(kx, (B, T, N_EMBED), jnp.float32)
    w1, b1, w2, b2 = init_params(kp, N_EMBED)

    def ref_fn(xa, w1a, b1a, w2a, b2a):
        h = jnp.maximum(xa.reshape(-1, xa.shape[-1]) @ w1a + b1a, 0.0)
        return (h @ w2a + b2a).reshape(xa.shape)

    # f32 path (matches the PyTorch module's default dtype; reference path).
    ref = ref_fn(x, w1, b1, w2, b2)
    out = jax.block_until_ready(feed_forward(x, w1, b1, w2, b2))
    assert out.shape == (B, T, N_EMBED)
    assert jnp.allclose(out, ref, atol=1e-5, rtol=1e-5)

    # bf16 storage path (recommended fast path: bf16 MXU inputs, f32 accumulate).
    xb, w1b, b1b, w2b, b2b = (t.astype(jnp.bfloat16) for t in (x, w1, b1, w2, b2))
    out_bf16 = jax.block_until_ready(feed_forward(xb, w1b, b1b, w2b, b2b))
    assert out_bf16.shape == (B, T, N_EMBED)
    assert out_bf16.dtype == jnp.bfloat16
    assert jnp.allclose(out_bf16.astype(jnp.float32), ref, atol=5e-2, rtol=5e-2)

    # Larger M: multi-step grid with a ragged tail block (no wrapper padding,
    # no post-kernel slice).
    B2, T2 = 4, 67        # M = 268 -> tm = 128, 3 grid steps, last one ragged
    x_big = jax.random.normal(jax.random.PRNGKey(1), (B2, T2, N_EMBED),
                              jnp.float32)
    ref_big = ref_fn(x_big, w1, b1, w2, b2)
    out_big = jax.block_until_ready(feed_forward(x_big, w1, b1, w2, b2))
    assert out_big.shape == (B2, T2, N_EMBED)
    assert jnp.allclose(out_big, ref_big, atol=1e-4, rtol=1e-4)

    print("KERNEL_OK")
</pallas_src>

<mosaic_0001>
module attributes {stable_mosaic.version = 11 : i64} {
  func.func @_ffn_kernel(%arg0: i32, %arg1: memref<8x32xf32, #tpu.memory_space<vmem>>, %arg2: memref<32x128xf32, #tpu.memory_space<vmem>>, %arg3: memref<1x128xf32, #tpu.memory_space<vmem>>, %arg4: memref<128x32xf32, #tpu.memory_space<vmem>>, %arg5: memref<1x32xf32, #tpu.memory_space<vmem>>, %arg6: memref<8x32xf32, #tpu.memory_space<vmem>>) attributes {dimension_semantics = [#tpu.dimension_semantics<parallel>], iteration_bounds = array<i64: 2>, scalar_prefetch = 0 : i64, scratch_operands = 0 : i64, tpu.core_type = #tpu.core_type<tc>, window_params = [{transform_indices = @transform_0, window_bounds = array<i64: 8, 32>}, {pipeline_mode = #tpu.pipeline_mode<synchronous>, transform_indices = @transform_1, window_bounds = array<i64: 32, 128>}, {pipeline_mode = #tpu.pipeline_mode<synchronous>, transform_indices = @transform_2, window_bounds = array<i64: 1, 128>}, {pipeline_mode = #tpu.pipeline_mode<synchronous>, transform_indices = @transform_3, window_bounds = array<i64: 128, 32>}, {pipeline_mode = #tpu.pipeline_mode<synchronous>, transform_indices = @transform_4, window_bounds = array<i64: 1, 32>}, {transform_indices = @transform_5, window_bounds = array<i64: 8, 32>}]} {
    %c0 = arith.constant 0 : index
    %c0_0 = arith.constant 0 : index
    %0 = vector.load %arg1[%c0, %c0_0] : memref<8x32xf32, #tpu.memory_space<vmem>>, vector<8x32xf32>
    %c0_1 = arith.constant 0 : index
    %c0_2 = arith.constant 0 : index
    %1 = vector.load %arg2[%c0_1, %c0_2] : memref<32x128xf32, #tpu.memory_space<vmem>>, vector<32x128xf32>
    %cst = arith.constant dense<0.000000e+00> : vector<8x128xf32>
    %2 = tpu.matmul %0, %1, %cst {dimension_numbers = #tpu.dot_dimension_numbers<[1], [0], [0], [1], [0, 0, 1, 1], [], []>} : vector<8x32xf32>, vector<32x128xf32>, vector<8x128xf32> -> vector<8x128xf32>
    %c0_3 = arith.constant 0 : index
    %c0_4 = arith.constant 0 : index
    %3 = vector.load %arg3[%c0_3, %c0_4] : memref<1x128xf32, #tpu.memory_space<vmem>>, vector<1x128xf32>
    %4 = vector.broadcast %3 : vector<1x128xf32> to vector<8x128xf32>
    %5 = arith.addf %2, %4 : vector<8x128xf32>
    %cst_5 = arith.constant 0.000000e+00 : f32
    %6 = vector.broadcast %cst_5 : f32 to vector<8x128xf32>
    %7 = arith.maximumf %5, %6 : vector<8x128xf32>
    %c0_6 = arith.constant 0 : index
    %c0_7 = arith.constant 0 : index
    %8 = vector.load %arg4[%c0_6, %c0_7] : memref<128x32xf32, #tpu.memory_space<vmem>>, vector<128x32xf32>
    %cst_8 = arith.constant dense<0.000000e+00> : vector<8x32xf32>
    %9 = tpu.matmul %7, %8, %cst_8 {dimension_numbers = #tpu.dot_dimension_numbers<[1], [0], [0], [1], [0, 0, 1, 1], [], []>} : vector<8x128xf32>, vector<128x32xf32>, vector<8x32xf32> -> vector<8x32xf32>
    %c0_9 = arith.constant 0 : index
    %c0_10 = arith.constant 0 : index
    %10 = vector.load %arg5[%c0_9, %c0_10] : memref<1x32xf32, #tpu.memory_space<vmem>>, vector<1x32xf32>
    %11 = vector.broadcast %10 : vector<1x32xf32> to vector<8x32xf32>
    %12 = arith.addf %9, %11 : vector<8x32xf32>
    %c0_11 = arith.constant 0 : index
    %c0_12 = arith.constant 0 : index
    %13 = vector.load %arg6[%c0_11, %c0_12] : memref<8x32xf32, #tpu.memory_space<vmem>>, vector<8x32xf32>
    tpu.vector_store %arg6[%c0_11, %c0_12], %12 {strides = array<i32>} : memref<8x32xf32, #tpu.memory_space<vmem>>, vector<8x32xf32>,
    return
  }
  func.func @transform_0(%arg0: i32) -> (i32, i32) {
    %c0_i32 = arith.constant 0 : i32
    %c0_i32_0 = arith.constant 0 : i32
    return %arg0, %c0_i32 : i32, i32
  }
  func.func @transform_1(%arg0: i32) -> (i32, i32) {
    %c0_i32 = arith.constant 0 : i32
    %c0_i32_0 = arith.constant 0 : i32
    %c0_i32_1 = arith.constant 0 : i32
    return %c0_i32, %c0_i32_0 : i32, i32
  }
  func.func @transform_2(%arg0: i32) -> (i32, i32) {
    %c0_i32 = arith.constant 0 : i32
    %c0_i32_0 = arith.constant 0 : i32
    %c0_i32_1 = arith.constant 0 : i32
    return %c0_i32, %c0_i32_0 : i32, i32
  }
  func.func @transform_3(%arg0: i32) -> (i32, i32) {
    %c0_i32 = arith.constant 0 : i32
    %c0_i32_0 = arith.constant 0 : i32
    %c0_i32_1 = arith.constant 0 : i32
    return %c0_i32, %c0_i32_0 : i32, i32
  }
  func.func @transform_4(%arg0: i32) -> (i32, i32) {
    %c0_i32 = arith.constant 0 : i32
    %c0_i32_0 = arith.constant 0 : i32
    %c0_i32_1 = arith.constant 0 : i32
    return %c0_i32, %c0_i32_0 : i32, i32
  }
  func.func @transform_5(%arg0: i32) -> (i32, i32) {
    %c0_i32 = arith.constant 0 : i32
    %c0_i32_0 = arith.constant 0 : i32
    return %arg0, %c0_i32 : i32, i32
  }
}

</mosaic_0001>

<bundles_post_ra>
// kernel: _ffn_pallas.1
= control target key start
LH: loop header
LB: loop body
LE: loop exit
PB: predicated region body
PF: predicated region fallthrough
CT: control target
= control target key end

     0   :  { %10 = vsyncpa [#allocation3], 0  ;;  %s893_s0 = inlined_call_operand.vmem [shape: f32[16,32], index: 0, kind: input, shape index: {}]   ;;  %s894_s1 = inlined_call_operand.vmem [shape: f32[32,128], index: 1, kind: input, shape index: {}]   ;;  %s895_s2 = inlined_call_operand.vmem [shape: f32[1,128], index: 2, kind: input, shape index: {}]   ;;  %s896_s3 = inlined_call_operand.vmem [shape: f32[128,32], index: 3, kind: input, shape index: {}]   ;;  %s897_s4 = inlined_call_operand.vmem [shape: f32[1,32], index: 4, kind: input, shape index: {}]   ;;  %s898_s5 = inlined_call_operand.hbm [shape: f32[16,32], index: 5, kind: output, shape index: {}]  }
   0x1   :  { %12 = vsyncpa [#allocation3 + $0x1], 0  ;;  %s725_s18 = smov 0   ;;  %s727_s19 = smov 0  }
   0x2   :  { %s729_s20 = smov 0   ;;  %s731_s21 = smov 0  }
   0x3 LB: > { %s746_s22 = sadd.s32 4294967295, %s689_s21   ;;  %s474_s23 = sadd.s32 4294967294, %s689_s21   ;;  %s689_s21 = sphi %s731_s21, %s904_s21   ;;  %s685_s20 = sphi %s729_s20, %s903_s20   ;;  %s681_s19 = sphi %s727_s19, %s902_s19   ;;  %s677_s18 = sphi %s725_s18, %s901_s18  }
   0x4   : > { %s750_s24 = sadd.s32 1, %s689_s21   ;;  %s135_s25 = sadd.s32 1, %s685_s20 }
   0x5   : > { %s132_s26 = ssub.s32 %s689_s21, %s750_s24  ;;  %p145_p0 = scmp.ne.s32.totalorder %s685_s20, %s681_s19 }
   0x6   : > { %p133_p1 = scmp.eq.s32.totalorder %s132_s26, 0  ;;  %p146_p2 = scmp.eq.s32.totalorder %s746_s22, 1 }
   0x7   : > { %p151_p3 = scmp.ne.s32.totalorder %s681_s19, %s677_s18  ;;  %p152_p4 = scmp.eq.s32.totalorder %s474_s23, 1 }
   0x8   : > { %s761_s27 = scalar_select %p133_p1, %s685_s20, %s135_s25  }
   0x9   : > { %p763_p5 = por %p146_p2, %p145_p0  ;;  %p767_p6 = por %p152_p4, %p151_p3 }
   0xa   : > { %p477_p7 = scmp.ge.s32.totalorder %s689_s21, 1  ;;  %p189_p8 = scmp.lt.s32.totalorder %s689_s21, 3 }
   0xc   : > { %p190_p9 = pnand %p477_p7, %p189_p8 }
   0xd   : > { %v221_v0 = vld [vmem:[%s894_s1] sm:$0xff] (!%p190_p9)  ;;  %v222_v1 = vld [vmem:[%s894_s1 + $0x8] sm:$0xff] (!%p190_p9)  ;;  %v223_v2 = vld [vmem:[%s894_s1 + $0x10] sm:$0xff] (!%p190_p9)  ;;  %v691_v3 = vmov (!%p190_p9), 0.0|0.0   ;;  %vm692_vm0 = vmmov (!%p190_p9), 0   ;;  %v693_v6 = vmov (!%p190_p9), 0.0  }
   0xe   : > { %193 = sbr.rel (%p190_p9) target bundleno = 470 (0x1d6), region = 40  ;;  %555 = vmatprep.subr.bf16.mxu0 (!%p190_p9), %v691_v3  ;;  %v556_v4 = vpack.c.bf16 (!%p190_p9), %v222_v1, %v221_v0  ;;  %v224_v5 = vld [vmem:[%s894_s1 + $0x18] sm:$0xff] (!%p190_p9)  ;;  %517 = vmatprep.mubr.msk.f32.mxu0 (!%p190_p9), %vm692_vm0, %v693_v6  ;;  %p216_p10 = scmp.lt.s32.totalorder (!%p190_p9), %s746_s22, 1  ;;  %v307_v7 = vld [vmem:[%s896_s3] sm:$0xff] (!%p190_p9)  ;;  %v308_v8 = vld [vmem:[%s896_s3 + $0x8] sm:$0xff] (!%p190_p9)  ;;  %vm232_vm1 = vcmask (!%p190_p9), 261120  }
   0xf   : > { %561 = vmatprep.subr.bf16.mxu1 (!%p190_p9), %v691_v3  ;;  %v562_v9 = vpack.c.bf16 (!%p190_p9), %v308_v8, %v307_v7  ;;  %v309_v10 = vld [vmem:[%s896_s3 + $0x10] sm:$0xff] (!%p190_p9)  ;;  %v310_v11 = vld [vmem:[%s896_s3 + $0x18] sm:$0xff] (!%p190_p9)  ;;  %552 = vmatprep.mubr.msk.f32.mxu1 (!%p190_p9), %vm692_vm0, %v693_v6  ;;  %v559_v12 = vpack.c.bf16 (!%p190_p9), %v224_v5, %v223_v2  ;;  %v311_v14 = vld [vmem:[%s896_s3 + $0x20] sm:$0xff] (!%p190_p9)  ;;  %s213_s26 = sand.u32 (!%p190_p9), 1, %s681_s19   ;;  %s484_s8 = sshll.u32 (!%p190_p9), %s746_s22, 7 }
  0x10   : > { %557 = vmatpush3.bf16.msra.mxu0 (!%p190_p9), %v556_v4  ;;  %v565_v13 = vpack.c.bf16 (!%p190_p9), %v310_v11, %v309_v10  ;;  %v312_v15 = vld [vmem:[%s896_s3 + $0x28] sm:$0xff] (!%p190_p9)  ;;  %v313_v18 = vld [vmem:[%s896_s3 + $0x30] sm:$0xff] (!%p190_p9)  ;;  %v314_v19 = vld [vmem:[%s896_s3 + $0x38] sm:$0xff] (!%p190_p9)  ;;  %s402_s14 = scalar_lea.sflag (!%p190_p9), [#allocation3], %s213_s26 }
  0x11   : > { %558 = vmatprep.subr.bf16.mxu0 (!%p190_p9), %v691_v3  ;;  %563 = vmatpush3.bf16.msra.mxu1 (!%p190_p9), %v562_v9  ;;  %v568_v17 = vpack.c.bf16 (!%p190_p9), %v312_v15, %v311_v14  ;;  %v571_v20 = vpack.c.bf16 (!%p190_p9), %v314_v19, %v313_v18  ;;  %v315_v21 = vld [vmem:[%s896_s3 + $0x40] sm:$0xff] (!%p190_p9)  ;;  %v316_v22 = vld [vmem:[%s896_s3 + $0x48] sm:$0xff] (!%p190_p9)  ;;  %v317_v24 = vld [vmem:[%s896_s3 + $0x50] sm:$0xff] (!%p190_p9) }
  0x12   : > { %564 = vmatprep.subr.bf16.mxu1 (!%p190_p9), %v691_v3  ;;  %v574_v23 = vpack.c.bf16 (!%p190_p9), %v316_v22, %v315_v21  ;;  %v318_v25 = vld [vmem:[%s896_s3 + $0x58] sm:$0xff] (!%p190_p9)  ;;  %v319_v27 = vld [vmem:[%s896_s3 + $0x60] sm:$0xff] (!%p190_p9)  ;;  %v320_v28 = vld [vmem:[%s896_s3 + $0x68] sm:$0xff] (!%p190_p9) }
  0x13   : > { %v577_v26 = vpack.c.bf16 (!%p190_p9), %v318_v25, %v317_v24  ;;  %v580_v29 = vpack.c.bf16 (!%p190_p9), %v320_v28, %v319_v27  ;;  %v321_v30 = vld [vmem:[%s896_s3 + $0x70] sm:$0xff] (!%p190_p9)  ;;  %v322_v31 = vld [vmem:[%s896_s3 + $0x78] sm:$0xff] (!%p190_p9)  ;;  %v480_v33 = vld [vmem:[%s895_s2] ss:$0 sm:$0xff] (!%p190_p9) }
  0x14   : > { %560 = vmatpush3.bf16.msra.mxu0 (!%p190_p9), %v559_v12  ;;  %v583_v32 = vpack.c.bf16 (!%p190_p9), %v322_v31, %v321_v30  ;;  %v482_v38 = vld [vmem:[%s897_s4] ss:$0 sm:$0xff] (!%p190_p9) }
  0x15   : > { %s217_s30 = scalar_select %p216_p10, %s746_s22, 1  ;;  %566 = vmatpush3.bf16.msra.mxu1 %v565_v13 }
  0x16   : > { %567 = vmatprep.subr.bf16.mxu1 %v691_v3  ;;  %s694_s22 = smov [#allocation2]  }
  0x17   : > { %s479_s6 = sshll.u32 %s217_s30, 3  ;;  %s478_s30 = sshll.u32 %s213_s26, 3 }
  0x18   : > { %s219_s13 = scalar_lea.vmem %s893_s0, %s479_s6  ;;  %s215_s9 = scalar_lea.vmem [#allocation2], %s478_s30 }
  0x19   : > { %v220_v16 = vld [vmem:[%s219_s13] sm:$0xff]  ;;  %569 = vmatpush3.bf16.msra.mxu1 %v568_v17  ;;  %s415_s10 = sshll.u32 %s215_s9, 4  ;;  %s850_s13 = scalar_lea.hbm %s898_s5, %s484_s8  ;;  %s852_s10 = int_to_ptr.vmem [resolvable:$true] %s415_s10 }
  0x1a   : > { %518 = vmatmul.mubr.msk.f32.vlgmr.msra.gmra.mrb[0].mxu0 %vm232_vm1, %v220_v16  ;;  %570 = vmatprep.subr.bf16.mxu1 %v691_v3  ;;  %s627_s15 = scalar_lea.vmem %s852_s10, 128  ;;  %s631_s16 = sshll.u32 %s694_s22, 4  ;;  %s632_s16 = int_to_ptr.vmem [resolvable:$false] %s631_s16 }
  0x1b   : > { %p628_p11 = scmp.ne.s32.totalorder %s852_s10, %s627_s15  ;;  %s633_s17 = scalar_lea.vmem %s632_s16, 256 }
  0x1c   : > { %p634_p0 = scmp.lt.s32.totalorder %s852_s10, %s632_s16  ;;  %p635_p1 = scmp.lt.s32.totalorder %s633_s17, %s627_s15 }
  0x1d   : > { %572 = vmatpush3.bf16.msra.mxu1 %v571_v20  ;;  %p629_p12 = pnand %p628_p11, %p763_p5 }
  0x1e   : > { %573 = vmatprep.subr.bf16.mxu1 %v691_v3  ;;  %p636_p2 = por %p635_p1, %p634_p0 }
  0x1f   : > { %p630_p13 = pneg %p629_p12 }
  0x21   : > { %575 = vmatpush3.bf16.msra.mxu1 %v574_v23  ;;  %p637_p3 = pnand %p636_p2, %p630_p13 }
  0x22   : > { %576 = vmatprep.subr.bf16.mxu1 %v691_v3 }
  0x25   : > { %578 = vmatpush3.bf16.msra.mxu1 %v577_v26 }
  0x26   : > { %579 = vmatprep.subr.bf16.mxu1 %v691_v3 }
  0x29   : > { %581 = vmatpush3.bf16.msra.mxu1 %v580_v29 }
  0x2a   : > { %582 = vmatprep.subr.bf16.mxu1 %v691_v3 }
  0x2d   : > { %584 = vmatpush3.bf16.msra.mxu1 %v583_v32 }
  0xed   : > { %v302_v34 = vpop.f32.mrb[0].mxu0 }
  0xee   : > { %v303_v35 = vadd.f32 %v480_v33, %v302_v34  ;;  %v519_v36 = vpop.f32.mrb[1].mxu0 }
  0xf0   : > { %v306_v37 = vmax.f32 %v303_v35, 0.0 }
  0xf2   : > { %553 = vmatmul.mubr.f32.vlgmr.msra.gmra.mrb[0].mxu1 %v306_v37 }
 0x1c5   : > { %v396_v39 = vpop.f32.mrb[0].mxu1 }
 0x1c6   : > { %v397_v40 = vadd.f32 %v482_v38, %v396_v39  ;;  %v554_v41 = vpop.f32.mrb[1].mxu1 }
 0x1c8   : > { %400 = vst.msk [vmem:[%s215_s9] sm:$0xff] %vm232_vm1, %v397_v40 }
 0x1c9   : > { %640 = shalt.err (!%p637_p3)
}
 0x1ca   : > { %s641_s23 = scalar_lea.hbm %s850_s13, 128  ;;  %s645_s30 = scalar_lea.hbm %s898_s5, 256 }
 0x1cb   : > { %p642_p4 = scmp.ne.s32.totalorder %s850_s13, %s641_s23  ;;  %p646_p9 = scmp.lt.u32.totalorder %s850_s13, %s898_s5 }
 0x1cc   : > { %p647_p10 = scmp.lt.u32.totalorder %s645_s30, %s641_s23  ;;  %p649_p12 = scmp.lt.u32.totalorder %s641_s23, %s850_s13 }
 0x1cd   : > { %p643_p7 = pnand %p642_p4, %p763_p5 }
 0x1ce   : > { %p648_p11 = por %p647_p10, %p646_p9 }
 0x1cf   : > { %p644_p8 = pneg %p643_p7 }
 0x1d0   : > { %p650_p13 = por %p649_p12, %p648_p11 }
 0x1d2   : > { %p651_p0 = pnand %p650_p13, %p644_p8 }
 0x1d4   : > { %654 = shalt.err (!%p651_p0)
}
 0x1d5   : > { %585 = dma.vmem_to_hbm [thread:$0]  (%p763_p5), %s852_s10, 128, %s850_s13, %s402_s14  }
 0x1d6 PF: > { %p591_p1 = scmp.ge.s32.totalorder %s689_s21, 2  ;;  %s427_s8 = sand.u32 1, %s677_s18  }
 0x1d7   : > { %s428_s9 = scalar_lea.sflag [#allocation3], %s427_s8 }
 0x1d8   : > { %p588_p2 = pnand %p591_p1, %p767_p6 }
 0x1da   : > { %672 = dma.done.wait (!%p588_p2), %s428_s9, 128  }
 0x1db   : > { %674 = vsyncadd (!%p588_p2), %s428_s9, 4294967168  ;;  %p15_p3 = scmp.ge.s32.totalorder %s750_s24, 4   ;;  %s901_s18 = smov %s681_s19 }
 0x1dc   : > { %s902_s19 = smov %s685_s20  ;;  %s903_s20 = smov %s761_s27 }
 0x1dd   : > { %s904_s21 = smov %s750_s24  ;;  %17 = sbr.rel (!%p15_p3) target bundleno = 3 (0x3), region = 75 }
 0x1e4   :  { %433 = vsyncpa [#allocation3], 1 }
 0x1e5   :  { %435 = vsyncpa [#allocation3 + $0x1], 1 }

</bundles_post_ra>
